<compile_context>
chip_gen: v7x
topology: tpu7x:2x2x1
jax: 0.10.0
libtpu: 0.0.40
codegen_flags: <defaults>
</compile_context>

<pallas_src>
import functools

import jax
import jax.numpy as jnp
from jax import lax
from jax.experimental import pallas as pl
from jax.experimental.pallas import tpu as pltpu


def _round_up(x, m):
    return ((x + m - 1) // m) * m


@functools.lru_cache(maxsize=None)
def _tpu_generation():
    """Returns (physical_vmem_bytes, select_gather_max_sets) for this chip."""
    kind = ""
    try:
        kind = jax.devices()[0].device_kind.lower()
    except Exception:
        pass
    if "v7" in kind:
        vmem, sel_max = 64 * 1024 * 1024, 4      # 64 MiB / TC, tightest VALU budget
    elif "v6" in kind:
        vmem, sel_max = 128 * 1024 * 1024, 8
    elif "v5" in kind or "v4" in kind:
        vmem, sel_max = 128 * 1024 * 1024, 16
    else:
        vmem, sel_max = 64 * 1024 * 1024, 8      # conservative default
    try:
        # Refine downwards only (never trust a larger number than the default).
        vmem = min(vmem, int(pltpu.get_tpu_info().vmem_capacity_bytes))
    except Exception:
        pass
    return vmem, sel_max


def _mod_weights_kernel(ids_ref, x_ref, deltas_ref, o_ref, *,
                        n_delta_sets, use_clamping, use_select_gather):
    """One (tb, td) tile: gather delta rows, multiply, optional clamp.

    ids_ref    : [tb, 1]    int32  delta-set index per row of this batch tile
    x_ref      : [tb, td]   f32    input-representation tile
    deltas_ref : [nds, td]  f32    deltas table slice along the lane axis
    o_ref      : [tb, td]   f32    output tile
    """
    ids = ids_ref[...]                       # (tb, 1)
    x = x_ref[...]                           # (tb, td)
    deltas = deltas_ref[...]                 # (nds, td)

    if use_select_gather:
        # VPU gather: seed with deltas[0] broadcast (no s==0 compare), then
        # (n_delta_sets - 1) compare+selects. Exact, stays off the MXU.
        gathered = jnp.broadcast_to(deltas[0:1, :], x.shape)
        for s in range(1, n_delta_sets):
            gathered = jnp.where(ids == s, deltas[s:s + 1, :], gathered)
    else:
        # Larger table: one-hot (tb, nds) @ deltas (nds, td) on the MXU.
        # HIGHEST precision keeps the f32 deltas exact (no bf16 single pass);
        # the extra MXU passes are hidden under the HBM-bound tile.
        set_iota = lax.broadcasted_iota(
            jnp.int32, (ids.shape[0], n_delta_sets), 1)
        onehot = (ids == set_iota).astype(jnp.float32)
        gathered = jnp.dot(onehot, deltas,
                           preferred_element_type=jnp.float32,
                           precision=lax.Precision.HIGHEST)

    out = x.astype(jnp.float32) * gathered
    if use_clamping:
        out = jnp.clip(out, 0.0, 2.0)
    o_ref[...] = out.astype(o_ref.dtype)


def _choose_lane_tile(D):
    """Largest lane-dense (multiple-of-128) tile dividing D, else full D."""
    if D % 128 == 0:
        for cand in (4096, 2048, 1024, 512, 256, 128):
            if cand <= D and D % cand == 0:
                return cand
    # D < 128 or not lane aligned: full-D block. Stores are masked partial
    # vst at these toy sizes; pure XLA would be equally fine there.
    return D


def _choose_batch_tile(B, td, nds, vmem_budget):
    """Largest batch tile (multiple of 8) that fits the VMEM budget."""
    # Per-step accounting (f32 / int32):
    #   x + out tiles, double-buffered: 2 bufs * 2 arrays * td * 4 = 16*td /row
    #   ids tile, lane-padded to 128:   2 bufs * 128 * 4           = 1024  /row
    #   in-kernel temporaries (gathered, pre-store out):   ~2 * td * 4 = 8*td /row
    resident = 2 * nds * td * 4              # double-buffered deltas slice
    bytes_per_row = 24 * td + 1024
    tb_cap = max(8, (vmem_budget - resident) // bytes_per_row)
    limit = _round_up(B, 8)
    for cand in (2048, 1024, 512, 256, 128, 64, 32, 16, 8):
        if cand <= tb_cap and cand <= limit:
            return cand
    return min(B, 8)


def multiply_modular_weights(in_repr, user_idxs, deltas, user_to_delta_set,
                             *, use_clamping=False, tb=None, td=None):
    """Pallas forward of MultiplyModularWeights.

    in_repr:            f32 [B, D]
    user_idxs:          i32 [B]
    deltas:             f32 [n_delta_sets, D]
    user_to_delta_set:  i32 [n_users]
    """
    B, D = in_repr.shape
    nds = deltas.shape[0]

    vmem_phys, sel_max = _tpu_generation()
    # Leave roughly half of physical VMEM for Mosaic internal scratch and the
    # surrounding program; scoped limit stays well under the physical size
    # (v5e/v6e: ~57 MiB budget / 96 MiB limit; v7x: ~28 MiB / 48 MiB).
    vmem_budget = min(int(vmem_phys * 0.45), 60 * 1024 * 1024)
    vmem_limit = min(int(vmem_phys * 0.75), 100 * 1024 * 1024)

    if td is None:
        td = _choose_lane_tile(D)
    if tb is None:
        tb = _choose_batch_tile(B, td, nds, vmem_budget)
    assert D % td == 0, "lane tile must divide latent_dim"

    # Glue: user idx -> delta-set idx (integer gather kept in plain JAX).
    delta_ids = user_to_delta_set[user_idxs].astype(jnp.int32).reshape(B, 1)

    # Pad batch to a multiple of the tile so the grid is exact. Padded rows
    # use delta set 0 and multiply zero inputs; they are sliced off below.
    B_pad = _round_up(B, tb)
    x = in_repr
    if B_pad != B:
        x = jnp.pad(in_repr, ((0, B_pad - B), (0, 0)))
        delta_ids = jnp.pad(delta_ids, ((0, B_pad - B), (0, 0)))

    lane_blocks = D // td
    batch_blocks = B_pad // tb
    use_select_gather = nds <= sel_max

    kernel = functools.partial(_mod_weights_kernel,
                               n_delta_sets=nds,
                               use_clamping=use_clamping,
                               use_select_gather=use_select_gather)

    if lane_blocks > 1:
        # Lane axis OUTER: the deltas block index only changes with the outer
        # index, so the (nds, td) slice is DMA'd lane_blocks times in total
        # instead of once per grid step.
        grid = (lane_blocks, batch_blocks)
        ids_spec = pl.BlockSpec((tb, 1), lambda j, i: (i, 0))
        x_spec = pl.BlockSpec((tb, td), lambda j, i: (i, j))
        # TODO(synk): pipeline_mode=pl.Buffered(1) would drop the redundant
        # second deltas buffer (~nds*td*4 bytes); kept at the default double
        # buffer for jax-version compatibility since the slice is tiny.
        d_spec = pl.BlockSpec((nds, td), lambda j, i: (0, j))
        o_spec = pl.BlockSpec((tb, td), lambda j, i: (i, j))
        dim_sem = ("parallel", "parallel")
    else:
        # Single lane block: keep batch as the (only) leading parallel axis so
        # megacore still splits work; deltas index is constant -> one fetch.
        grid = (batch_blocks,)
        ids_spec = pl.BlockSpec((tb, 1), lambda i: (i, 0))
        x_spec = pl.BlockSpec((tb, td), lambda i: (i, 0))
        d_spec = pl.BlockSpec((nds, td), lambda i: (0, 0))
        o_spec = pl.BlockSpec((tb, td), lambda i: (i, 0))
        dim_sem = ("parallel",)

    itemsize = jnp.dtype(in_repr.dtype).itemsize
    gather_flops = 2 * (nds - 1) if use_select_gather else 2 * nds
    cost = pl.CostEstimate(
        flops=B_pad * D * (2 + gather_flops),
        transcendentals=0,
        bytes_accessed=2 * B_pad * D * itemsize + nds * D * 4 + B_pad * 4,
    )

    out = pl.pallas_call(
        kernel,
        out_shape=jax.ShapeDtypeStruct((B_pad, D), in_repr.dtype),
        grid_spec=pltpu.PrefetchScalarGridSpec(
            num_scalar_prefetch=0,
            grid=grid,
            in_specs=[ids_spec, x_spec, d_spec],
            out_specs=o_spec,
        ),
        compiler_params=pltpu.CompilerParams(
            dimension_semantics=dim_sem,
            vmem_limit_bytes=vmem_limit),
        cost_estimate=cost,
    )(delta_ids, x, deltas)

    return out[:B] if B_pad != B else out


def _reference(in_repr, user_idxs, deltas, user_to_delta_set, use_clamping):
    out = in_repr * deltas[user_to_delta_set[user_idxs]]
    if use_clamping:
        out = jnp.clip(out, 0.0, 2.0)
    return out


def _run_case(key, batch, latent_dim, n_users, n_delta_sets, use_clamping,
              init_std=0.01):
    k_x, k_d, k_u, k_map = jax.random.split(key, 4)

    # Deterministic init matching nn.Parameter(1 + init_std * randn(...)).
    deltas = 1.0 + init_std * jax.random.normal(
        k_d, (n_delta_sets, latent_dim), dtype=jnp.float32)

    # user_to_delta_set covers the full range [0, n_delta_sets - 1].
    user_to_delta_set = jnp.concatenate([
        jnp.arange(n_delta_sets, dtype=jnp.int32),
        jax.random.randint(k_map, (n_users - n_delta_sets,), 0, n_delta_sets,
                           dtype=jnp.int32),
    ])

    in_repr = jax.random.normal(k_x, (batch, latent_dim), dtype=jnp.float32)
    user_idxs = jax.random.randint(k_u, (batch,), 0, n_users, dtype=jnp.int32)

    out = multiply_modular_weights(in_repr, user_idxs, deltas,
                                   user_to_delta_set,
                                   use_clamping=use_clamping)
    out = jax.block_until_ready(out)

    ref = _reference(in_repr, user_idxs, deltas, user_to_delta_set,
                     use_clamping)
    assert out.shape == (batch, latent_dim)
    assert jnp.allclose(out, ref, atol=1e-6, rtol=1e-6), (
        f"mismatch: batch={batch} D={latent_dim} nds={n_delta_sets} "
        f"clamp={use_clamping}")


if __name__ == "__main__":
    key = jax.random.PRNGKey(0)
    k1, k2, k3, k4, k5 = jax.random.split(key, 5)

    # Toy shape from the module (D < 128 -> full-D block, masked stores).
    _run_case(k1, batch=8, latent_dim=32, n_users=10, n_delta_sets=3,
              use_clamping=False)
    # Lane-dense small shape with clamping (select-gather path everywhere).
    _run_case(k2, batch=8, latent_dim=128, n_users=10, n_delta_sets=3,
              use_clamping=True)
    # Non-divisible batch (wrapper-side padding) + D=384 so the lane axis has
    # more than one block (lane-outer grid, resident deltas slice).
    _run_case(k3, batch=100, latent_dim=384, n_users=50, n_delta_sets=5,
              use_clamping=True)
    # Many delta sets: exact HIGHEST-precision one-hot MXU gather.
    _run_case(k4, batch=64, latent_dim=256, n_users=64, n_delta_sets=40,
              use_clamping=False)
    # Single delta set (degenerate broadcast path).
    _run_case(k5, batch=16, latent_dim=128, n_users=4, n_delta_sets=1,
              use_clamping=False)

    print("KERNEL_OK")
</pallas_src>

<mosaic_0001>
module attributes {stable_mosaic.version = 11 : i64} {
  func.func @_mod_weights_kernel(%arg0: i32, %arg1: memref<8x1xi32, #tpu.memory_space<vmem>>, %arg2: memref<8x32xf32, #tpu.memory_space<vmem>>, %arg3: memref<3x32xf32, #tpu.memory_space<vmem>>, %arg4: memref<8x32xf32, #tpu.memory_space<vmem>>) attributes {dimension_semantics = [#tpu.dimension_semantics<parallel>], iteration_bounds = array<i64: 1>, scalar_prefetch = 0 : i64, scratch_operands = 0 : i64, tpu.core_type = #tpu.core_type<tc>, window_params = [{transform_indices = @transform_0, window_bounds = array<i64: 8, 1>}, {transform_indices = @transform_1, window_bounds = array<i64: 8, 32>}, {pipeline_mode = #tpu.pipeline_mode<synchronous>, transform_indices = @transform_2, window_bounds = array<i64: 3, 32>}, {transform_indices = @transform_3, window_bounds = array<i64: 8, 32>}]} {
    %c0 = arith.constant 0 : index
    %c0_0 = arith.constant 0 : index
    %0 = vector.load %arg1[%c0, %c0_0] : memref<8x1xi32, #tpu.memory_space<vmem>>, vector<8x1xi32>
    %c0_1 = arith.constant 0 : index
    %c0_2 = arith.constant 0 : index
    %1 = vector.load %arg2[%c0_1, %c0_2] : memref<8x32xf32, #tpu.memory_space<vmem>>, vector<8x32xf32>
    %c0_3 = arith.constant 0 : index
    %c0_4 = arith.constant 0 : index
    %2 = vector.load %arg3[%c0_3, %c0_4] : memref<3x32xf32, #tpu.memory_space<vmem>>, vector<3x32xf32>
    %3 = vector.extract_strided_slice %2 {offsets = [0, 0], sizes = [1, 32], strides = [1, 1]} : vector<3x32xf32> to vector<1x32xf32>
    %4 = vector.shape_cast %3 : vector<1x32xf32> to vector<1x32xf32>
    %5 = vector.broadcast %4 : vector<1x32xf32> to vector<8x32xf32>
    %c1_i32 = arith.constant 1 : i32
    %6 = vector.broadcast %c1_i32 : i32 to vector<8x1xi32>
    %7 = arith.cmpi eq, %0, %6 : vector<8x1xi32>
    %8 = vector.extract_strided_slice %2 {offsets = [1, 0], sizes = [1, 32], strides = [1, 1]} : vector<3x32xf32> to vector<1x32xf32>
    %9 = vector.shape_cast %7 : vector<8x1xi1> to vector<8x1xi1>
    %10 = vector.broadcast %9 : vector<8x1xi1> to vector<8x32xi1>
    %11 = vector.shape_cast %8 : vector<1x32xf32> to vector<1x32xf32>
    %12 = vector.broadcast %11 : vector<1x32xf32> to vector<8x32xf32>
    %13 = arith.select %10, %12, %5 : vector<8x32xi1>, vector<8x32xf32>
    %c2_i32 = arith.constant 2 : i32
    %14 = vector.broadcast %c2_i32 : i32 to vector<8x1xi32>
    %15 = arith.cmpi eq, %0, %14 : vector<8x1xi32>
    %16 = vector.extract_strided_slice %2 {offsets = [2, 0], sizes = [1, 32], strides = [1, 1]} : vector<3x32xf32> to vector<1x32xf32>
    %17 = vector.shape_cast %15 : vector<8x1xi1> to vector<8x1xi1>
    %18 = vector.broadcast %17 : vector<8x1xi1> to vector<8x32xi1>
    %19 = vector.shape_cast %16 : vector<1x32xf32> to vector<1x32xf32>
    %20 = vector.broadcast %19 : vector<1x32xf32> to vector<8x32xf32>
    %21 = arith.select %18, %20, %13 : vector<8x32xi1>, vector<8x32xf32>
    %22 = arith.mulf %1, %21 : vector<8x32xf32>
    %c0_5 = arith.constant 0 : index
    %c0_6 = arith.constant 0 : index
    %23 = vector.load %arg4[%c0_5, %c0_6] : memref<8x32xf32, #tpu.memory_space<vmem>>, vector<8x32xf32>
    tpu.vector_store %arg4[%c0_5, %c0_6], %22 {strides = array<i32>} : memref<8x32xf32, #tpu.memory_space<vmem>>, vector<8x32xf32>,
    return
  }
  func.func @transform_0(%arg0: i32) -> (i32, i32) {
    %c0_i32 = arith.constant 0 : i32
    %c0_i32_0 = arith.constant 0 : i32
    return %arg0, %c0_i32 : i32, i32
  }
  func.func @transform_1(%arg0: i32) -> (i32, i32) {
    %c0_i32 = arith.constant 0 : i32
    %c0_i32_0 = arith.constant 0 : i32
    return %arg0, %c0_i32 : i32, i32
  }
  func.func @transform_2(%arg0: i32) -> (i32, i32) {
    %c0_i32 = arith.constant 0 : i32
    %c0_i32_0 = arith.constant 0 : i32
    %c0_i32_1 = arith.constant 0 : i32
    return %c0_i32, %c0_i32_0 : i32, i32
  }
  func.func @transform_3(%arg0: i32) -> (i32, i32) {
    %c0_i32 = arith.constant 0 : i32
    %c0_i32_0 = arith.constant 0 : i32
    return %arg0, %c0_i32 : i32, i32
  }
}

</mosaic_0001>

<bundles_post_ra>
// kernel: tpu_custom_call.1
= control target key start
LH: loop header
LB: loop body
LE: loop exit
PB: predicated region body
PF: predicated region fallthrough
CT: control target
= control target key end

     0   :  { %s131_s0 = inlined_call_operand.vmem [shape: s32[8,1], index: 0, kind: input, shape index: {}]   ;;  %s132_s1 = inlined_call_operand.vmem [shape: f32[8,32], index: 1, kind: input, shape index: {}]   ;;  %s133_s2 = inlined_call_operand.vmem [shape: f32[3,32], index: 2, kind: input, shape index: {}]   ;;  %s134_s3 = inlined_call_operand.hbm [shape: f32[8,32], index: 3, kind: output, shape index: {}]  }
   0x1   :  { %v15_v0 = vld [vmem:[%s131_s0] sm:$0xff] }
   0x2   :  { %8 = vsyncpa [#allocation3], 0  ;;  %v88_v1 = vmov 0   ;;  %vm22_vm0 = vcmp.eq.s32.totalorder %v15_v0, 1  ;;  %vm33_vm1 = vcmp.eq.s32.totalorder %v15_v0, 2  ;;  %v18_v4 = vlaneseq  ;;  %v16_v14 = vld [vmem:[%s132_s1] sm:$0xff] }
   0x3   :  { %63 = vset.pattern.permute.xlu0 %v88_v1  ;;  %v23_v2 = vsel %vm22_vm0, 1, %v88_v1  ;;  %v34_v3 = vsel %vm33_vm1, 1, %v88_v1  ;;  %v17_v8 = vld [vmem:[%s133_s2] sm:$0x7]  ;;  %s89_s17 = smov [#allocation2]   ;;  %vm45_vm4 = vcmask 261120  }
   0x4   :  { %25 = vperm.xlu0 %63, %v23_v2   ;;  %v19_v5 = vshrl.u32 %v18_v4, 7  ;;  %s53_s18 = sshll.u32 %s89_s17, 4  ;;  %s54_s18 = int_to_ptr.vmem [resolvable:$true] %s53_s18 }
   0x5   :  { %s64_s2 = scalar_lea.vmem %s54_s18, 128  ;;  %p69_p1 = scmp.lt.s32.totalorder %s54_s18, %s54_s18 }
   0x6   :  { %v20_v6 = vsub.s32 0, %v19_v5  ;;  %v30_v7 = vsub.s32 1, %v19_v5  ;;  %v41_v9 = vsub.s32 2, %v19_v5  ;;  %p65_p0 = scmp.ne.s32.totalorder %s54_s18, %s64_s2  ;;  %p70_p2 = scmp.lt.s32.totalorder %s64_s2, %s64_s2 }
   0x8   :  { %36 = vperm.xlu0 %63, %v34_v3   ;;  %v21_v11 = vrot.slane %v17_v8, %v20_v6  ;;  %v31_v12 = vrot.slane %v17_v8, %v30_v7  ;;  %v42_v13 = vrot.slane %v17_v8, %v41_v9  ;;  %p71_p3 = por %p70_p2, %p69_p1 }
   0xa   :  { %p72_p4 = pnand %p71_p3, %p65_p0 }
  0x83   :  { %v26_v10 = vpop.permute.xlu0 %25 }
  0x84   :  { %vm27_vm2 = vcmp.eq.s32.totalorder %v26_v10, 1 }
  0x85   :  { %v32_v16 = vsel %vm27_vm2, %v31_v12, %v21_v11 }
  0x87   :  { %v37_v15 = vpop.permute.xlu0 %36 }
  0x88   :  { %vm38_vm3 = vcmp.eq.s32.totalorder %v37_v15, 1 }
  0x89   :  { %v43_v17 = vsel %vm38_vm3, %v42_v13, %v32_v16 }
  0x8a   :  { %v44_v18 = vmul.f32 %v43_v17, %v16_v14 }
  0x8c   :  { %46 = vst.msk [vmem:[#allocation2] sm:$0xff] %vm45_vm4, %v44_v18 }
  0x8d   :  { %75 = shalt.err (!%p72_p4)
}
  0x8e   :  { %s76_s1 = scalar_lea.hbm %s134_s3, 128 }
  0x8f   :  { %p77_p5 = scmp.ne.s32.totalorder %s134_s3, %s76_s1  ;;  %p80_p6 = scmp.lt.u32.totalorder %s76_s1, %s134_s3 }
  0x91   :  { %p82_p7 = pnand %p80_p6, %p77_p5 }
  0x93   :  { %85 = shalt.err (!%p82_p7)
}
  0x94   :  { %56 = dma.vmem_to_hbm [thread:$0]  %s54_s18, 128, %s134_s3, [#allocation3]  }
  0x95   :  { %86 = dma.done.wait [#allocation3], 128  }
  0x96   :  { %87 = vsyncadd [#allocation3], 4294967168 }
  0x97   :  { %60 = vsyncpa [#allocation3], 1 }

</bundles_post_ra>
